<compile_context>
chip_gen: v7x
topology: tpu7x:2x2x1
jax: 0.10.0
libtpu: 0.0.40
codegen_flags: <defaults>
</compile_context>

<pallas_src>
import functools
import math

import jax
import jax.numpy as jnp
from jax import lax
from jax.experimental import pallas as pl
from jax.experimental.pallas import tpu as pltpu


# --------------------- Generation-aware sizing ------------------------------ #
def _tpu_vmem_bytes():
    try:
        return int(pltpu.get_tpu_info().vmem_capacity_bytes)
    except Exception:
        return 64 * 1024 * 1024  # conservative: v7x has 64 MiB per TensorCore


_VMEM_CAP = _tpu_vmem_bytes()
_SMALL_VMEM = _VMEM_CAP < 96 * 1024 * 1024          # v7x
_VMEM_LIMIT = (40 if _SMALL_VMEM else 96) * 1024 * 1024
_TQ_TARGET = 128 if _SMALL_VMEM else 256            # attention query-row tile
_TR_TARGET = 256 if _SMALL_VMEM else 512            # projection row tile


def _pick_tile(n, target):
    """Largest tile <= target dividing n, preferring 32/16/8-aligned sizes
    (keeps bf16 / int8 blocks on native sublane tiling)."""
    if n <= target:
        return n
    for align in (32, 16, 8):
        start = target - (target % align)
        for t in range(start, align - 1, -align):
            if n % t == 0:
                return t
    return n  # no well-aligned divisor: fall back to the full extent


# --------------------- Fused q/k/v input projection ------------------------- #
def _proj_qkv_kernel(xq_ref, xk_ref, xv_ref, wq_ref, bq_ref, wv_ref, bv_ref,
                     qo_ref, ko_ref, vo_ref, *, compute_dtype):
    wq = wq_ref[...]
    bq = bq_ref[...]
    qo_ref[...] = (jnp.dot(xq_ref[...].astype(compute_dtype), wq,
                           preferred_element_type=jnp.float32)
                   + bq).astype(qo_ref.dtype)
    ko_ref[...] = (jnp.dot(xk_ref[...].astype(compute_dtype), wq,
                           preferred_element_type=jnp.float32)
                   + bq).astype(ko_ref.dtype)
    vo_ref[...] = (jnp.dot(xv_ref[...].astype(compute_dtype), wv_ref[...],
                           preferred_element_type=jnp.float32)
                   + bv_ref[...]).astype(vo_ref.dtype)


def project_qkv(q, k, v, wq_h, bq_h, wv_h, bv_h, *, tr, compute_dtype):
    """q,k,v: (bs, S, d_model); wq_h/wv_h: (h, d_model, d_k) compute_dtype;
    bq_h/bv_h: (h, 1, d_k) f32.  Returns 3x (bs, h, S, d_k) in compute_dtype."""
    bs, S, d_model = q.shape
    h, _, d_k = wq_h.shape
    ns = S // tr
    x_spec = pl.BlockSpec((None, tr, d_model), lambda b, si, hh: (b, si, 0))
    w_spec = pl.BlockSpec((None, d_model, d_k), lambda b, si, hh: (hh, 0, 0))
    b_spec = pl.BlockSpec((None, 1, d_k), lambda b, si, hh: (hh, 0, 0))
    o_spec = pl.BlockSpec((None, None, tr, d_k), lambda b, si, hh: (b, hh, si, 0))
    out_sds = jax.ShapeDtypeStruct((bs, h, S, d_k), compute_dtype)
    kernel = functools.partial(_proj_qkv_kernel, compute_dtype=compute_dtype)
    return pl.pallas_call(
        kernel,
        out_shape=(out_sds, out_sds, out_sds),
        grid=(bs, ns, h),
        in_specs=[x_spec, x_spec, x_spec, w_spec, b_spec, w_spec, b_spec],
        out_specs=(o_spec, o_spec, o_spec),
        compiler_params=pltpu.CompilerParams(
            dimension_semantics=("parallel", "parallel", "parallel"),
            vmem_limit_bytes=_VMEM_LIMIT),
    )(q, k, v, wq_h, bq_h, wv_h, bv_h)


# --------------------- Output projection (all heads per step) --------------- #
def _out_proj_kernel(v_ref, w_ref, b_ref, o_ref, *, n_heads):
    # v_ref: (h, tr, d_k), w_ref: (h, d_k, d_model), b_ref: (1, d_model)
    acc = jnp.zeros(o_ref.shape, jnp.float32) + b_ref[...]
    for hh in range(n_heads):          # static unroll; sums the per-head dots
        acc = acc + jnp.dot(v_ref[hh], w_ref[hh],
                            preferred_element_type=jnp.float32)
    o_ref[...] = acc.astype(o_ref.dtype)


def out_projection(v_heads, w_heads, bias2d, *, tr, n_heads):
    """v_heads: (bs, h, S, d_k); w_heads: (h, d_k, d_model); bias2d: (1, d_model).
    One grid step per (batch, row-tile): lane-dense (tr, d_model) stores, no
    head-reduction grid axis / accumulator scratch."""
    bs, h, S, d_k = v_heads.shape
    d_model = w_heads.shape[-1]
    ns = S // tr
    kernel = functools.partial(_out_proj_kernel, n_heads=n_heads)
    return pl.pallas_call(
        kernel,
        out_shape=jax.ShapeDtypeStruct((bs, S, d_model), jnp.float32),
        grid=(bs, ns),
        in_specs=[
            pl.BlockSpec((None, h, tr, d_k), lambda b, si: (b, 0, si, 0)),
            pl.BlockSpec((h, d_k, d_model), lambda b, si: (0, 0, 0)),
            pl.BlockSpec((1, d_model), lambda b, si: (0, 0)),
        ],
        out_specs=pl.BlockSpec((None, tr, d_model), lambda b, si: (b, si, 0)),
        compiler_params=pltpu.CompilerParams(
            dimension_semantics=("parallel", "parallel"),
            vmem_limit_bytes=_VMEM_LIMIT),
    )(v_heads, w_heads, bias2d)


# ---------------------------- Attention kernel ------------------------------ #
def _attn_kernel(gamma_ref, q_ref, k_ref, v_ref, mask_ref, out_ref, scores_ref,
                 adj_ref, *, maxout, col_block, compute_dtype):
    hh = pl.program_id(1)
    qi = pl.program_id(2)
    tq, d_k = q_ref.shape
    S = k_ref.shape[0]

    valid = mask_ref[...] != 0
    neg = jnp.float32(-1e32)
    inv_sqrt_dk = jnp.float32(1.0 / math.sqrt(d_k))

    # Scaled scores (tq, S): contract q dim 1 against k dim 1 (no k transpose).
    # Operands are compute_dtype (bf16 in fast mode) -> f32 accumulation.
    scores = lax.dot_general(q_ref[...], k_ref[...], (((1,), (1,)), ((), ())),
                             preferred_element_type=jnp.float32) * inv_sqrt_dk

    # --- distance / forgetting effect (torch.no_grad() branch, f32 math) ---
    s_ = jnp.where(valid, scores, neg)
    e_ = jnp.exp(s_ - jnp.max(s_, axis=-1, keepdims=True))
    p_ = e_ * pl.reciprocal(jnp.sum(e_, axis=-1, keepdims=True), approx=True)

    gamma = -jnp.abs(gamma_ref[hh])                  # scalar, per head (SMEM)

    # Blocked suffix-sum (disttotal - distcum) fused with the distance effect:
    # per 128/256-wide column block, a small triangular matmul + running carry,
    # then position_effect/sqrt/exp on that block only, writing scores*effect
    # straight into the (tq, S) VMEM scratch.  O(tq*S*cb) MXU FLOPs, ~3 live
    # (tq, S) f32 temporaries instead of ~6.
    # TODO(synk): if S is not a multiple of 128, cb falls back to S (full-width
    # triangular matmul); pad S upstream for best performance in that case.
    cb = col_block
    nb = S // cb
    kk = lax.broadcasted_iota(jnp.int32, (cb, cb), 0)
    jj = lax.broadcasted_iota(jnp.int32, (cb, cb), 1)
    after = (kk > jj).astype(compute_dtype)          # after[k, j] = 1 iff k > j
    row = (lax.broadcasted_iota(jnp.float32, (tq, cb), 0)
           + (qi * tq).astype(jnp.float32))          # global query index
    col0 = lax.broadcasted_iota(jnp.float32, (tq, cb), 1)
    carry = jnp.zeros((tq, 1), jnp.float32)
    for b in range(nb - 1, -1, -1):                  # right-to-left carry
        lo, hi = b * cb, (b + 1) * cb
        blk = p_[:, lo:hi]
        suffix = jnp.dot(blk.astype(compute_dtype), after,
                         preferred_element_type=jnp.float32) + carry
        carry = carry + jnp.sum(blk, axis=-1, keepdims=True)
        position_effect = jnp.abs((col0 + float(lo)) - row)      # |x1 - x2|
        dist = jnp.sqrt(jnp.maximum(suffix * position_effect, 0.0))
        effect = jnp.clip(jnp.exp(dist * gamma), 1e-5, 1e5)
        adj_ref[:, lo:hi] = scores[:, lo:hi] * effect

    # --- final masked softmax (exact division for reference parity) ---
    adj = jnp.where(valid, adj_ref[...], neg)
    es = jnp.exp(adj - jnp.max(adj, axis=-1, keepdims=True))
    probs = es / jnp.sum(es, axis=-1, keepdims=True)
    probs = jnp.where(valid, probs, 0.0)

    if maxout:
        scale = jnp.minimum(1.0 / jnp.max(probs, axis=-1, keepdims=True), 5.0)
        probs = probs * scale

    scores_ref[...] = probs.astype(scores_ref.dtype)
    out_ref[...] = jnp.dot(probs.astype(compute_dtype), v_ref[...],
                           preferred_element_type=jnp.float32
                           ).astype(out_ref.dtype)


def pallas_attention(q, k, v, mask2d, gammas, *, maxout, tq, compute_dtype,
                     scores_dtype):
    """q, k, v: (bs, h, S, d_k) compute_dtype; mask2d: (S, S) int8;
    gammas: (h,) f32."""
    bs, n_heads, S, d_k = q.shape
    nq = S // tq
    # 256-wide column blocks fill the 256x256 MXU on v6e/v7x; 128 is the
    # native shape on v5e and the fallback.
    cb = 256 if S % 256 == 0 else (128 if S % 128 == 0 else S)
    kernel = functools.partial(_attn_kernel, maxout=maxout, col_block=cb,
                               compute_dtype=compute_dtype)
    out, scores = pl.pallas_call(
        kernel,
        out_shape=(
            jax.ShapeDtypeStruct((bs, n_heads, S, d_k), compute_dtype),
            jax.ShapeDtypeStruct((bs, n_heads, S, S), scores_dtype),
        ),
        grid=(bs, n_heads, nq),
        in_specs=[
            pl.BlockSpec(memory_space=pltpu.MemorySpace.SMEM),        # gammas (h,)
            pl.BlockSpec((None, None, tq, d_k), lambda b, hh, qi: (b, hh, qi, 0)),
            pl.BlockSpec((None, None, S, d_k), lambda b, hh, qi: (b, hh, 0, 0)),
            pl.BlockSpec((None, None, S, d_k), lambda b, hh, qi: (b, hh, 0, 0)),
            pl.BlockSpec((tq, S), lambda b, hh, qi: (qi, 0)),         # int8 mask
        ],
        out_specs=[
            pl.BlockSpec((None, None, tq, d_k), lambda b, hh, qi: (b, hh, qi, 0)),
            pl.BlockSpec((None, None, tq, S), lambda b, hh, qi: (b, hh, qi, 0)),
        ],
        scratch_shapes=[pltpu.VMEM((tq, S), jnp.float32)],            # adj_ref
        compiler_params=pltpu.CompilerParams(
            dimension_semantics=("parallel", "parallel", "parallel"),
            vmem_limit_bytes=_VMEM_LIMIT),
    )(gammas, q, k, v, mask2d)
    return out, scores


# --------------------------- Module-level wrapper --------------------------- #
def multi_head_attention(q, k, v, mask, params, *, n_heads, maxout=False,
                         compute_dtype=jnp.bfloat16, scores_dtype=None):
    """Forward of MultiHeadAttention (kq_same=True, bias=True).

    q, k, v: (bs, S, d_model) f32; mask: (1, 1, S, S) (nonzero == attend).
    compute_dtype: MXU-operand / inter-kernel activation dtype (bf16 default;
    pass jnp.float32 for exact parity with the f32 PyTorch reference).
    Returns (output (bs, S, d_model) f32, scores (bs, h, S, S) scores_dtype).
    """
    bs, S, d_model = q.shape
    d_k = d_model // n_heads
    cdt = compute_dtype
    scores_dtype = cdt if scores_dtype is None else scores_dtype

    wq, bq = params["wq"], params["bq"]              # shared by q and k (kq_same)
    wv, bv = params["wv"], params["bv"]
    wo, bo = params["wo"], params["bo"]
    gammas = params["gammas"].reshape(n_heads).astype(jnp.float32)

    # One-time, weight-sized re-layouts (no activation transposes anywhere).
    wq_h = wq.reshape(d_model, n_heads, d_k).transpose(1, 0, 2).astype(cdt)
    wv_h = wv.reshape(d_model, n_heads, d_k).transpose(1, 0, 2).astype(cdt)
    bq_h = bq.reshape(n_heads, 1, d_k).astype(jnp.float32)
    bv_h = bv.reshape(n_heads, 1, d_k).astype(jnp.float32)
    wo_h = wo.reshape(n_heads, d_k, d_model).astype(cdt)
    bo2d = bo.reshape(1, d_model).astype(jnp.float32)

    tr = _pick_tile(S, _TR_TARGET)
    tq = _pick_tile(S, _TQ_TARGET)

    qh, kh, vh = project_qkv(q, k, v, wq_h, bq_h, wv_h, bv_h,
                             tr=tr, compute_dtype=cdt)     # (bs, h, S, d_k)

    mask2d = (mask.reshape(S, S) != 0).astype(jnp.int8)
    v_, scores = pallas_attention(qh, kh, vh, mask2d, gammas, maxout=maxout,
                                  tq=tq, compute_dtype=cdt,
                                  scores_dtype=scores_dtype)

    output = out_projection(v_, wo_h, bo2d, tr=tr, n_heads=n_heads)
    return output, scores


# ------------------------------- Reference ---------------------------------- #
def _ref_forward(q, k, v, mask, params, *, n_heads, maxout=False):
    bs, seqlen, d_model = q.shape
    d_k = d_model // n_heads
    wq, bq, wv, bv, wo, bo = (params["wq"], params["bq"], params["wv"],
                              params["bv"], params["wo"], params["bo"])
    gammas = params["gammas"]

    def proj(x, w, b):
        return (x @ w + b).reshape(bs, seqlen, n_heads, d_k).transpose(0, 2, 1, 3)

    qh, kh, vh = proj(q, wq, bq), proj(k, wq, bq), proj(v, wv, bv)

    scores = jnp.einsum("bhqd,bhkd->bhqk", qh, kh) / math.sqrt(d_k)
    x1 = jnp.broadcast_to(jnp.arange(seqlen, dtype=jnp.float32), (seqlen, seqlen))
    x2 = x1.T
    scores_ = jnp.where(mask == 0, -1e32, scores)
    scores_ = jax.nn.softmax(scores_, axis=-1)
    distcum = jnp.cumsum(scores_, axis=-1)
    disttot = jnp.sum(scores_, axis=-1, keepdims=True)
    pos = jnp.abs(x1 - x2)[None, None]
    dist = jnp.sqrt(jnp.maximum((disttot - distcum) * pos, 0.0))
    gamma = -jnp.abs(gammas)[None]                   # (1, h, 1, 1)
    tot = jnp.clip(jnp.exp(dist * gamma), 1e-5, 1e5)
    scores = scores * tot
    scores = jnp.where(mask == 0, -1e32, scores)
    scores = jax.nn.softmax(scores, axis=-1)
    scores = jnp.where(mask == 0, 0.0, scores)
    if maxout:
        scale = jnp.minimum(1.0 / jnp.max(scores, axis=-1, keepdims=True), 5.0)
        scores = scores * scale
    v_ = jnp.einsum("bhqk,bhkd->bhqd", scores, vh)
    concat = v_.transpose(0, 2, 1, 3).reshape(bs, seqlen, d_model)
    return concat @ wo + bo, scores


# ---------------------------------- Main ------------------------------------ #
if __name__ == "__main__":
    d_model, n_heads, bs, seqlen = 32, 4, 2, 8
    key = jax.random.PRNGKey(0)
    ks = jax.random.split(key, 12)

    bound = 1.0 / math.sqrt(d_model)
    params = {
        "wq": jax.random.uniform(ks[0], (d_model, d_model), jnp.float32, -bound, bound),
        "bq": jax.random.uniform(ks[1], (d_model,), jnp.float32, -bound, bound),
        "wv": jax.random.uniform(ks[2], (d_model, d_model), jnp.float32, -bound, bound),
        "bv": jax.random.uniform(ks[3], (d_model,), jnp.float32, -bound, bound),
        "wo": jax.random.uniform(ks[4], (d_model, d_model), jnp.float32, -bound, bound),
        "bo": jax.random.uniform(ks[5], (d_model,), jnp.float32, -bound, bound),
        # xavier_uniform on (n_heads, 1, 1): small values
        "gammas": jax.random.uniform(ks[6], (n_heads, 1, 1), jnp.float32, -1.0, 1.0),
    }

    q = jax.random.normal(ks[7], (bs, seqlen, d_model), jnp.float32)
    k = jax.random.normal(ks[8], (bs, seqlen, d_model), jnp.float32)
    v = jax.random.normal(ks[9], (bs, seqlen, d_model), jnp.float32)
    # causal mask (attend to self and past), shape (1, 1, S, S)
    mask = jnp.tril(jnp.ones((seqlen, seqlen), jnp.float32))[None, None]

    for maxout in (False, True):
        ref_out, ref_scores = _ref_forward(q, k, v, mask, params,
                                           n_heads=n_heads, maxout=maxout)

        # Exact path (f32 MXU operands): tight parity with the PyTorch math;
        # remaining error is the approx reciprocal in the no-grad branch.
        out32, sc32 = multi_head_attention(q, k, v, mask, params,
                                           n_heads=n_heads, maxout=maxout,
                                           compute_dtype=jnp.float32)
        jax.block_until_ready((out32, sc32))
        assert jnp.allclose(out32, ref_out, rtol=5e-3, atol=5e-3)
        assert jnp.allclose(sc32, ref_scores, rtol=5e-3, atol=5e-3)

        # Fast path (default): bf16 MXU operands, bf16 inter-kernel activations
        # and bf16 probability writeback -> looser tolerance vs f32 reference.
        out16, sc16 = multi_head_attention(q, k, v, mask, params,
                                           n_heads=n_heads, maxout=maxout)
        jax.block_until_ready((out16, sc16))
        assert jnp.allclose(out16.astype(jnp.float32), ref_out,
                            rtol=5e-2, atol=5e-2)
        assert jnp.allclose(sc16.astype(jnp.float32), ref_scores,
                            rtol=5e-2, atol=5e-2)

    print("KERNEL_OK")
</pallas_src>

<mosaic_0001>
module attributes {stable_mosaic.version = 11 : i64} {
  func.func @_proj_qkv_kernel(%arg0: i32, %arg1: i32, %arg2: i32, %arg3: memref<1x8x32xf32, #tpu.memory_space<vmem>>, %arg4: memref<1x8x32xf32, #tpu.memory_space<vmem>>, %arg5: memref<1x8x32xf32, #tpu.memory_space<vmem>>, %arg6: memref<1x32x8xf32, #tpu.memory_space<vmem>>, %arg7: memref<1x1x8xf32, #tpu.memory_space<vmem>>, %arg8: memref<1x32x8xf32, #tpu.memory_space<vmem>>, %arg9: memref<1x1x8xf32, #tpu.memory_space<vmem>>, %arg10: memref<1x1x8x8xf32, #tpu.memory_space<vmem>>, %arg11: memref<1x1x8x8xf32, #tpu.memory_space<vmem>>, %arg12: memref<1x1x8x8xf32, #tpu.memory_space<vmem>>) attributes {dimension_semantics = [#tpu.dimension_semantics<parallel>, #tpu.dimension_semantics<parallel>, #tpu.dimension_semantics<parallel>], iteration_bounds = array<i64: 2, 1, 4>, scalar_prefetch = 0 : i64, scratch_operands = 0 : i64, tpu.core_type = #tpu.core_type<tc>, window_params = [{transform_indices = @transform_0, window_bounds = array<i64: 1, 8, 32>}, {transform_indices = @transform_1, window_bounds = array<i64: 1, 8, 32>}, {transform_indices = @transform_2, window_bounds = array<i64: 1, 8, 32>}, {transform_indices = @transform_3, window_bounds = array<i64: 1, 32, 8>}, {transform_indices = @transform_4, window_bounds = array<i64: 1, 1, 8>}, {transform_indices = @transform_5, window_bounds = array<i64: 1, 32, 8>}, {transform_indices = @transform_6, window_bounds = array<i64: 1, 1, 8>}, {transform_indices = @transform_7, window_bounds = array<i64: 1, 1, 8, 8>}, {transform_indices = @transform_8, window_bounds = array<i64: 1, 1, 8, 8>}, {transform_indices = @transform_9, window_bounds = array<i64: 1, 1, 8, 8>}]} {
    %c0 = arith.constant 0 : index
    %c0_0 = arith.constant 0 : index
    %c0_1 = arith.constant 0 : index
    %0 = vector.load %arg6[%c0, %c0_0, %c0_1] : memref<1x32x8xf32, #tpu.memory_space<vmem>>, vector<1x32x8xf32>
    %1 = vector.shape_cast %0 : vector<1x32x8xf32> to vector<32x8xf32>
    %c0_2 = arith.constant 0 : index
    %c0_3 = arith.constant 0 : index
    %c0_4 = arith.constant 0 : index
    %2 = vector.load %arg7[%c0_2, %c0_3, %c0_4] : memref<1x1x8xf32, #tpu.memory_space<vmem>>, vector<1x1x8xf32>
    %3 = vector.shape_cast %2 : vector<1x1x8xf32> to vector<1x8xf32>
    %c0_5 = arith.constant 0 : index
    %c0_6 = arith.constant 0 : index
    %c0_7 = arith.constant 0 : index
    %4 = vector.load %arg3[%c0_5, %c0_6, %c0_7] : memref<1x8x32xf32, #tpu.memory_space<vmem>>, vector<1x8x32xf32>
    %5 = vector.shape_cast %4 : vector<1x8x32xf32> to vector<8x32xf32>
    %cst = arith.constant dense<0.000000e+00> : vector<8x8xf32>
    %6 = tpu.matmul %5, %1, %cst {dimension_numbers = #tpu.dot_dimension_numbers<[1], [0], [0], [1], [0, 0, 1, 1], [], []>} : vector<8x32xf32>, vector<32x8xf32>, vector<8x8xf32> -> vector<8x8xf32>
    %7 = vector.broadcast %3 : vector<1x8xf32> to vector<8x8xf32>
    %8 = arith.addf %6, %7 : vector<8x8xf32>
    %c0_8 = arith.constant 0 : index
    %c0_9 = arith.constant 0 : index
    %c0_10 = arith.constant 0 : index
    %c0_11 = arith.constant 0 : index
    %9 = vector.load %arg10[%c0_8, %c0_9, %c0_10, %c0_11] : memref<1x1x8x8xf32, #tpu.memory_space<vmem>>, vector<1x1x8x8xf32>
    %10 = vector.shape_cast %9 : vector<1x1x8x8xf32> to vector<8x8xf32>
    %11 = vector.shape_cast %8 : vector<8x8xf32> to vector<1x1x8x8xf32>
    tpu.vector_store %arg10[%c0_8, %c0_9, %c0_10, %c0_11], %11 {strides = array<i32>} : memref<1x1x8x8xf32, #tpu.memory_space<vmem>>, vector<1x1x8x8xf32>,
    %c0_12 = arith.constant 0 : index
    %c0_13 = arith.constant 0 : index
    %c0_14 = arith.constant 0 : index
    %12 = vector.load %arg4[%c0_12, %c0_13, %c0_14] : memref<1x8x32xf32, #tpu.memory_space<vmem>>, vector<1x8x32xf32>
    %13 = vector.shape_cast %12 : vector<1x8x32xf32> to vector<8x32xf32>
    %cst_15 = arith.constant dense<0.000000e+00> : vector<8x8xf32>
    %14 = tpu.matmul %13, %1, %cst_15 {dimension_numbers = #tpu.dot_dimension_numbers<[1], [0], [0], [1], [0, 0, 1, 1], [], []>} : vector<8x32xf32>, vector<32x8xf32>, vector<8x8xf32> -> vector<8x8xf32>
    %15 = vector.broadcast %3 : vector<1x8xf32> to vector<8x8xf32>
    %16 = arith.addf %14, %15 : vector<8x8xf32>
    %c0_16 = arith.constant 0 : index
    %c0_17 = arith.constant 0 : index
    %c0_18 = arith.constant 0 : index
    %c0_19 = arith.constant 0 : index
    %17 = vector.load %arg11[%c0_16, %c0_17, %c0_18, %c0_19] : memref<1x1x8x8xf32, #tpu.memory_space<vmem>>, vector<1x1x8x8xf32>
    %18 = vector.shape_cast %17 : vector<1x1x8x8xf32> to vector<8x8xf32>
    %19 = vector.shape_cast %16 : vector<8x8xf32> to vector<1x1x8x8xf32>
    tpu.vector_store %arg11[%c0_16, %c0_17, %c0_18, %c0_19], %19 {strides = array<i32>} : memref<1x1x8x8xf32, #tpu.memory_space<vmem>>, vector<1x1x8x8xf32>,
    %c0_20 = arith.constant 0 : index
    %c0_21 = arith.constant 0 : index
    %c0_22 = arith.constant 0 : index
    %20 = vector.load %arg5[%c0_20, %c0_21, %c0_22] : memref<1x8x32xf32, #tpu.memory_space<vmem>>, vector<1x8x32xf32>
    %21 = vector.shape_cast %20 : vector<1x8x32xf32> to vector<8x32xf32>
    %c0_23 = arith.constant 0 : index
    %c0_24 = arith.constant 0 : index
    %c0_25 = arith.constant 0 : index
    %22 = vector.load %arg8[%c0_23, %c0_24, %c0_25] : memref<1x32x8xf32, #tpu.memory_space<vmem>>, vector<1x32x8xf32>
    %23 = vector.shape_cast %22 : vector<1x32x8xf32> to vector<32x8xf32>
    %cst_26 = arith.constant dense<0.000000e+00> : vector<8x8xf32>
    %24 = tpu.matmul %21, %23, %cst_26 {dimension_numbers = #tpu.dot_dimension_numbers<[1], [0], [0], [1], [0, 0, 1, 1], [], []>} : vector<8x32xf32>, vector<32x8xf32>, vector<8x8xf32> -> vector<8x8xf32>
    %c0_27 = arith.constant 0 : index
    %c0_28 = arith.constant 0 : index
    %c0_29 = arith.constant 0 : index
    %25 = vector.load %arg9[%c0_27, %c0_28, %c0_29] : memref<1x1x8xf32, #tpu.memory_space<vmem>>, vector<1x1x8xf32>
    %26 = vector.shape_cast %25 : vector<1x1x8xf32> to vector<1x8xf32>
    %27 = vector.broadcast %26 : vector<1x8xf32> to vector<8x8xf32>
    %28 = arith.addf %24, %27 : vector<8x8xf32>
    %c0_30 = arith.constant 0 : index
    %c0_31 = arith.constant 0 : index
    %c0_32 = arith.constant 0 : index
    %c0_33 = arith.constant 0 : index
    %29 = vector.load %arg12[%c0_30, %c0_31, %c0_32, %c0_33] : memref<1x1x8x8xf32, #tpu.memory_space<vmem>>, vector<1x1x8x8xf32>
    %30 = vector.shape_cast %29 : vector<1x1x8x8xf32> to vector<8x8xf32>
    %31 = vector.shape_cast %28 : vector<8x8xf32> to vector<1x1x8x8xf32>
    tpu.vector_store %arg12[%c0_30, %c0_31, %c0_32, %c0_33], %31 {strides = array<i32>} : memref<1x1x8x8xf32, #tpu.memory_space<vmem>>, vector<1x1x8x8xf32>,
    return
  }
  func.func @transform_0(%arg0: i32, %arg1: i32, %arg2: i32) -> (i32, i32, i32) {
    %c0_i32 = arith.constant 0 : i32
    %c0_i32_0 = arith.constant 0 : i32
    return %arg0, %arg1, %c0_i32 : i32, i32, i32
  }
  func.func @transform_1(%arg0: i32, %arg1: i32, %arg2: i32) -> (i32, i32, i32) {
    %c0_i32 = arith.constant 0 : i32
    %c0_i32_0 = arith.constant 0 : i32
    return %arg0, %arg1, %c0_i32 : i32, i32, i32
  }
  func.func @transform_2(%arg0: i32, %arg1: i32, %arg2: i32) -> (i32, i32, i32) {
    %c0_i32 = arith.constant 0 : i32
    %c0_i32_0 = arith.constant 0 : i32
    return %arg0, %arg1, %c0_i32 : i32, i32, i32
  }
  func.func @transform_3(%arg0: i32, %arg1: i32, %arg2: i32) -> (i32, i32, i32) {
    %c0_i32 = arith.constant 0 : i32
    %c0_i32_0 = arith.constant 0 : i32
    %c0_i32_1 = arith.constant 0 : i32
    return %arg2, %c0_i32, %c0_i32_0 : i32, i32, i32
  }
  func.func @transform_4(%arg0: i32, %arg1: i32, %arg2: i32) -> (i32, i32, i32) {
    %c0_i32 = arith.constant 0 : i32
    %c0_i32_0 = arith.constant 0 : i32
    %c0_i32_1 = arith.constant 0 : i32
    return %arg2, %c0_i32, %c0_i32_0 : i32, i32, i32
  }
  func.func @transform_5(%arg0: i32, %arg1: i32, %arg2: i32) -> (i32, i32, i32) {
    %c0_i32 = arith.constant 0 : i32
    %c0_i32_0 = arith.constant 0 : i32
    %c0_i32_1 = arith.constant 0 : i32
    return %arg2, %c0_i32, %c0_i32_0 : i32, i32, i32
  }
  func.func @transform_6(%arg0: i32, %arg1: i32, %arg2: i32) -> (i32, i32, i32) {
    %c0_i32 = arith.constant 0 : i32
    %c0_i32_0 = arith.constant 0 : i32
    %c0_i32_1 = arith.constant 0 : i32
    return %arg2, %c0_i32, %c0_i32_0 : i32, i32, i32
  }
  func.func @transform_7(%arg0: i32, %arg1: i32, %arg2: i32) -> (i32, i32, i32, i32) {
    %c0_i32 = arith.constant 0 : i32
    %c0_i32_0 = arith.constant 0 : i32
    return %arg0, %arg2, %arg1, %c0_i32 : i32, i32, i32, i32
  }
  func.func @transform_8(%arg0: i32, %arg1: i32, %arg2: i32) -> (i32, i32, i32, i32) {
    %c0_i32 = arith.constant 0 : i32
    %c0_i32_0 = arith.constant 0 : i32
    return %arg0, %arg2, %arg1, %c0_i32 : i32, i32, i32, i32
  }
  func.func @transform_9(%arg0: i32, %arg1: i32, %arg2: i32) -> (i32, i32, i32, i32) {
    %c0_i32 = arith.constant 0 : i32
    %c0_i32_0 = arith.constant 0 : i32
    return %arg0, %arg2, %arg1, %c0_i32 : i32, i32, i32, i32
  }
}

</mosaic_0001>

<bundles_post_ra>
// kernel: tpu_custom_call.1
= control target key start
LH: loop header
LB: loop body
LE: loop exit
PB: predicated region body
PF: predicated region fallthrough
CT: control target
= control target key end

     0   :  { %s1686_s0 = inlined_call_operand.vmem [shape: f32[2,8,32], index: 0, kind: input, shape index: {}]   ;;  %s1687_s1 = inlined_call_operand.vmem [shape: f32[2,8,32], index: 1, kind: input, shape index: {}]   ;;  %s1688_s2 = inlined_call_operand.vmem [shape: f32[2,8,32], index: 2, kind: input, shape index: {}]   ;;  %s1689_s3 = inlined_call_operand.vmem [shape: f32[4,32,8], index: 3, kind: input, shape index: {}]   ;;  %s1690_s4 = inlined_call_operand.vmem [shape: f32[4,1,8], index: 4, kind: input, shape index: {}]   ;;  %s1691_s5 = inlined_call_operand.vmem [shape: f32[4,32,8], index: 5, kind: input, shape index: {}]   ;;  %s1692_s6 = inlined_call_operand.vmem [shape: f32[4,1,8], index: 6, kind: input, shape index: {}]   ;;  %s1693_s7 = inlined_call_operand.hbm [shape: f32[2,4,8,8], index: 7, kind: output, shape index: {0}]   ;;  %s1694_s8 = inlined_call_operand.hbm [shape: f32[2,4,8,8], index: 8, kind: output, shape index: {1}]   ;;  %s1695_s9 = inlined_call_operand.hbm [shape: f32[2,4,8,8], index: 9, kind: output, shape index: {2}]  }
   0x1   :  { %1703 = sst [smem:[#allocation14_spill]] %s1686_s0 }
   0x2   :  { %1704 = sst [smem:[#allocation15_spill]] %s1687_s1 }
   0x3   :  { %1705 = sst [smem:[#allocation16_spill]] %s1689_s3 }
   0x4   :  { %15 = vsyncpa [#allocation3], 0 }
   0x5   :  { %17 = vsyncpa [#allocation3 + $0x1], 0 }
   0x6   :  { %18 = vsyncpa [#allocation5], 0 }
   0x7   :  { %20 = vsyncpa [#allocation5 + $0x1], 0  ;;  %s1433_s30 = smov 0   ;;  %s1435_s10 = smov 0  }
   0x8   :  { %s1437_s11 = smov 0   ;;  %s1439_s12 = smov 0  }
   0x9   :  { %s1441_s13 = smov 0   ;;  %s1443_s14 = smov 0  }
   0xa   :  { %s1445_s15 = smov 0   ;;  %s1447_s16 = smov 0  }
   0xb LB: > { %1706 = sst [smem:[#allocation9_spill]] %s1367_s14  ;;  %s1697_s17 = sadd.s32 4294967295, %s1375_s16   ;;  %s1375_s16 = sphi %s1447_s16, %s26_s16   ;;  %s1371_s15 = sphi %s1445_s15, %s1723_s15   ;;  %s1367_s14 = sphi %s1443_s14, %s1722_s14   ;;  %s1363_s13 = sphi %s1441_s13, %s1721_s13   ;;  %s1359_s12 = sphi %s1439_s12, %s1720_s12   ;;  %s1355_s11 = sphi %s1437_s11, %s1726_s11   ;;  %s1351_s10 = sphi %s1435_s10, %s1725_s10   ;;  %s1347_s30 = sphi %s1433_s30, %s1724_s30  }
   0xc   : > { %1707 = sst [smem:[#allocation10_spill]] %s1371_s15  ;;  %s1696_s18 = sadd.s32 4294967294, %s1375_s16  }
   0xd   : > { %s38_s19 = sadd.s32 1, %s1367_s14  ;;  %s45_s20 = sadd.s32 1, %s1371_s15 }
   0xe   : > { %p39_p0 = scmp.ge.s32.totalorder %s38_s19, 4  ;;  %p254_p1 = scmp.ne.s32.totalorder %s1355_s11, %s1351_s10 }
   0xf   : > { %p255_p2 = scmp.eq.s32.totalorder %s1697_s17, 7  ;;  %p260_p5 = scmp.ne.s32.totalorder %s1351_s10, %s1347_s30 }
  0x10   : > { %s1728_s19 = smov (%p39_p0, %s38_s19), 0  ;;  %s1730_s20 = smov (!%p39_p0, %s45_s20), %s1371_s15 }
  0x11   : > { %1708 = sst [smem:[#allocation11_spill]] %s1728_s19  ;;  %s238_s21 = ssub.s32 %s1367_s14, %s1728_s19 }
  0x12   : > { %p1486_p3 = por %p255_p2, %p254_p1  ;;  %p47_p4 = scmp.ge.s32.totalorder %s1730_s20, 2 }
  0x13   : > { %p261_p6 = scmp.eq.s32.totalorder %s1696_s18, 7  ;;  %p1042_p7 = scmp.ge.s32.totalorder %s1375_s16, 1 }
  0x14   : > { %s1732_s20 = smov (%p47_p4, %s1730_s20), 0  ;;  %p397_p9 = scmp.lt.s32.totalorder %s1375_s16, 9 }
  0x15   : > { %1710 = sst [smem:[#allocation12_spill]] %s1732_s20  ;;  %p1497_p8 = por %p261_p6, %p260_p5 }
  0x16   : > { %s237_s24 = ssub.s32 %s1371_s15, %s1732_s20  ;;  %s244_s25 = sadd.s32 1, %s1355_s11 }
  0x17   : > { %s239_s26 = sor.u32 %s238_s21, %s237_s24  ;;  %p398_p10 = pnand %p1042_p7, %p397_p9 }
  0x18   : > { %p242_p11 = scmp.eq.s32.totalorder %s239_s26, 0  ;;  %p496_p12 = scmp.lt.s32.totalorder (!%p398_p10), %s1359_s12, 3  ;;  %v1377_v0 = vmov (!%p398_p10), 0.0|0.0   ;;  %vm1378_vm0 = vmmov (!%p398_p10), 0   ;;  %v1379_v1 = vmov (!%p398_p10), 0.0   ;;  %vm524_vm1 = vcmask (!%p398_p10), 261120  }
  0x19   : > { %401 = sbr.rel (%p398_p10) target bundleno = 322 (0x142), region = 48  ;;  %p475_p13 = scmp.lt.s32.totalorder (!%p398_p10), %s1363_s13, 1  ;;  %1119 = vmatprep.subr.bf16.mxu0 (!%p398_p10), %v1377_v0  ;;  %1125 = vmatprep.subr.bf16.mxu1 (!%p398_p10), %v1377_v0  ;;  %vm598_vm2 = vcmask (!%p398_p10), 64512  }
  0x1a   : > { %s1506_s27 = scalar_select %p242_p11, %s1355_s11, %s244_s25  }
  0x1b   : > { %1094 = vmatprep.mubr.msk.f32.mxu0 (!%p398_p10), %vm1378_vm0, %v1379_v1  ;;  %1105 = vmatprep.mubr.msk.f32.mxu1 (!%p398_p10), %vm1378_vm0, %v1379_v1  ;;  %s1713_s3 = sld [smem:[#allocation16_spill]] (!%p398_p10)  ;;  %s1714_s0 = sld [smem:[#allocation14_spill]] (!%p398_p10) }
  0x1c   : > { %1712 = sst [smem:[#allocation13_spill]] %s1506_s27  ;;  %s1715_s1 = sld [smem:[#allocation15_spill]] (!%p398_p10) }
  0x1d   : > { %s1702_s17 = sand.u32 (!%p398_p10), 1, %s1351_s10   ;;  %s1061_s18 = sshll.u32 (!%p398_p10), %s1363_s13, 2 }
  0x1e   : > { %s1716_s24 = sadd.s32 (!%p398_p10), 4294967295, %s1375_s16  }
  0x1f   : > { %s1549_s25 = sand.u32 (!%p398_p10), 1, %s1716_s24  }
  0x20   : > { %s1511_s28 = scalar_select %p496_p12, %s1359_s12, 3 }
  0x21   : > { %s476_s29 = scalar_select %p475_p13, %s1363_s13, 1 }
  0x22   : > { %s1069_s21 = sshll.u32 %s1511_s28, 5 }
  0x23   : > { %s500_s26 = scalar_lea.vmem %s1713_s3, %s1069_s21  ;;  %s508_s20 = scalar_lea.vmem %s1691_s5, %s1069_s21 }
  0x24   : > { %v512_v2 = vld [vmem:[%s500_s26] sm:$0xff]  ;;  %v513_v3 = vld [vmem:[%s500_s26 + $0x8] sm:$0xff]  ;;  %v514_v4 = vld [vmem:[%s500_s26 + $0x10] sm:$0xff]  ;;  %s1046_s19 = sshll.u32 %s476_s29, 3 }
  0x25   : > { %v1120_v5 = vpack.c.bf16 %v513_v3, %v512_v2  ;;  %v515_v6 = vld [vmem:[%s500_s26 + $0x18] sm:$0xff]  ;;  %s481_s27 = scalar_lea.vmem %s1714_s0, %s1046_s19  ;;  %v676_v8 = vld [vmem:[%s508_s20] sm:$0xff]  ;;  %v677_v9 = vld [vmem:[%s508_s20 + $0x8] sm:$0xff]  ;;  %s488_s3 = scalar_lea.vmem %s1715_s1, %s1046_s19 }
  0x26   : > { %v1123_v7 = vpack.c.bf16 %v515_v6, %v514_v4  ;;  %v517_v10 = vld [vmem:[%s481_s27] sm:$0xff]  ;;  %v1132_v11 = vpack.c.bf16 %v677_v9, %v676_v8  ;;  %v678_v13 = vld [vmem:[%s508_s20 + $0x10] sm:$0xff]  ;;  %v679_v14 = vld [vmem:[%s508_s20 + $0x18] sm:$0xff]  ;;  %s1540_s20 = sshll.u32 %s1702_s17, 3  ;;  %s784_s27 = sadd.s32 %s1359_s12, %s1061_s18 }
  0x27   : > { %1121 = vmatpush3.bf16.msra.mxu0 %v1120_v5  ;;  %1127 = vmatpush3.bf16.msra.mxu1 %v1120_v5  ;;  %v600_v12 = vld [vmem:[%s488_s3] sm:$0xff]  ;;  %v1135_v15 = vpack.c.bf16 %v679_v14, %v678_v13  ;;  %s495_s3 = scalar_lea.vmem %s1688_s2, %s1046_s19  ;;  %s503_s26 = scalar_lea.vmem %s1690_s4, %s1511_s28 }
  0x28   : > { %1122 = vmatprep.subr.bf16.mxu0 %v1377_v0  ;;  %1128 = vmatprep.subr.bf16.mxu1 %v1377_v0  ;;  %v675_v16 = vld [vmem:[%s495_s3] sm:$0xff]  ;;  %s1551_s19 = sshll.u32 %s784_s27, 7  ;;  %s467_s13 = scalar_lea.vmem [#allocation4], %s1540_s20 }
  0x29   : > { %v1053_v17 = vld [vmem:[%s503_s26] ss:$0 sm:$0xff]  ;;  %s804_s14 = sshll.u32 %s467_s13, 4  ;;  %s460_s15 = scalar_lea.vmem [#allocation2], %s1540_s20  ;;  %s1561_s14 = int_to_ptr.vmem [resolvable:$true] %s804_s14 }
  0x2a   : > { %s788_s3 = sshll.u32 %s460_s15, 4  ;;  %s1559_s29 = scalar_lea.hbm %s1694_s8, %s1551_s19  ;;  %s1569_s3 = int_to_ptr.vmem [resolvable:$true] %s788_s3 }
  0x2b   : > { %1124 = vmatpush3.bf16.msra.mxu0 %v1123_v7  ;;  %1130 = vmatpush3.bf16.msra.mxu1 %v1123_v7  ;;  %s1567_s26 = scalar_lea.hbm %s1693_s7, %s1551_s19  ;;  %s511_s18 = scalar_lea.vmem %s1692_s6, %s1511_s28 }
  0x2c   : > { %1131 = vmatprep.subr.bf16.mxu0 %v1377_v0  ;;  %s767_s17 = scalar_lea.sflag [#allocation5], %s1549_s25  ;;  %s1221_s0 = scalar_lea.vmem %s1561_s14, 128 }
  0x2d   : > { %p1222_p0 = scmp.ne.s32.totalorder %s1561_s14, %s1221_s0  ;;  %s1380_s27 = smov [#allocation4]  }
  0x2e   : > { %1095 = vmatmul.mubr.msk.f32.vlgmr.msra.gmra.mrb[0].mxu0 %vm524_vm1, %v517_v10  ;;  %1106 = vmatmul.mubr.msk.f32.vlgmr.msra.gmra.mrb[0].mxu1 %vm524_vm1, %v600_v12  ;;  %s1225_s21 = sshll.u32 %s1380_s27, 4  ;;  %s1226_s21 = int_to_ptr.vmem [resolvable:$false] %s1225_s21 }
  0x2f   : > { %1133 = vmatpush3.bf16.msra.mxu0 %v1132_v11  ;;  %1116 = vmatprep.mubr.msk.f32.mxu0 %vm1378_vm0, %v1379_v1  ;;  %p1223_p1 = pnand %p1222_p0, %p1486_p3  ;;  %s1227_s1 = scalar_lea.vmem %s1226_s21, 256 }
  0x30   : > { %1134 = vmatprep.subr.bf16.mxu0 %v1377_v0  ;;  %p1228_p4 = scmp.lt.s32.totalorder %s1561_s14, %s1226_s21  ;;  %p1229_p5 = scmp.lt.s32.totalorder %s1227_s1, %s1221_s0 }
  0x31   : > { %p1224_p2 = pneg %p1223_p1 }
  0x32   : > { %p1230_p6 = por %p1229_p5, %p1228_p4 }
  0x33   : > { %1136 = vmatpush3.bf16.msra.mxu0 %v1135_v15 }
  0x34   : > { %p1231_p7 = pnand %p1230_p6, %p1224_p2 }
  0x36   : > { %1117 = vmatmul.mubr.msk.f32.vlgmr.msra.gmra.mrb[2].mxu0 %vm524_vm1, %v675_v16 }
 0x101   : > { %v594_v18 = vpop.f32.mrb[0].mxu0  ;;  %v670_v19 = vpop.f32.mrb[0].mxu1 }
 0x102   : > { %v595_v20 = vadd.f32 %v1053_v17, %v594_v18  ;;  %v1096_v21 = vpop.f32.mrb[1].mxu0  ;;  %v671_v22 = vadd.f32 %v1053_v17, %v670_v19  ;;  %v1107_v23 = vpop.f32.mrb[1].mxu1 }
 0x104   : > { %674 = vst.msk [vmem:[%s467_s13] sm:$0xff] %vm598_vm2, %v671_v22  ;;  %599 = vst.msk [vmem:[%s460_s15] sm:$0xff] %vm598_vm2, %v595_v20 }
 0x105   : > { %1234 = shalt.err (!%p1231_p7)
}
 0x106   : > { %s1235_s13 = scalar_lea.hbm %s1559_s29, 128  ;;  %s1239_s12 = scalar_lea.hbm %s1694_s8, 1024 }
 0x107   : > { %p1236_p9 = scmp.ne.s32.totalorder %s1559_s29, %s1235_s13  ;;  %p1240_p12 = scmp.lt.u32.totalorder %s1559_s29, %s1694_s8 }
 0x108   : > { %p1241_p13 = scmp.lt.u32.totalorder %s1239_s12, %s1235_s13  ;;  %p1243_p1 = scmp.lt.u32.totalorder %s1235_s13, %s1559_s29 }
 0x109   : > { %p1237_p10 = pnand %p1236_p9, %p1486_p3 }
 0x10a   : > { %p1242_p0 = por %p1241_p13, %p1240_p12 }
 0x10b   : > { %p1238_p11 = pneg %p1237_p10 }
 0x10c   : > { %p1244_p2 = por %p1243_p1, %p1242_p0 }
 0x10e   : > { %p1245_p4 = pnand %p1244_p2, %p1238_p11 }
 0x110   : > { %1248 = shalt.err (!%p1245_p4)
}
 0x111   : > { %1138 = dma.vmem_to_hbm [thread:$0]  (%p1486_p3), %s1561_s14, 128, %s1559_s29, %s767_s17  }
 0x112   : > { %s1717_s0 = sand.u32 1, %s1351_s10   ;;  %s1249_s15 = scalar_lea.vmem %s1569_s3, 128 }
 0x113   : > { %s762_s1 = scalar_lea.sflag [#allocation3], %s1717_s0  ;;  %p1250_p5 = scmp.ne.s32.totalorder %s1569_s3, %s1249_s15 }
 0x114   : > { %s1381_s13 = smov [#allocation2]  }
 0x115   : > { %p1251_p6 = pnand %p1250_p5, %p1486_p3  ;;  %s1253_s24 = sshll.u32 %s1381_s13, 4  ;;  %s1254_s24 = int_to_ptr.vmem [resolvable:$false] %s1253_s24 }
 0x116   : > { %s1255_s12 = scalar_lea.vmem %s1254_s24, 256  ;;  %p1256_p9 = scmp.lt.s32.totalorder %s1569_s3, %s1254_s24 }
 0x117   : > { %p1252_p7 = pneg %p1251_p6  ;;  %p1257_p10 = scmp.lt.s32.totalorder %s1255_s12, %s1249_s15 }
 0x119   : > { %p1258_p11 = por %p1257_p10, %p1256_p9 }
 0x11b   : > { %p1259_p12 = pnand %p1258_p11, %p1252_p7 }
 0x11d   : > { %1262 = shalt.err (!%p1259_p12)
}
 0x11e   : > { %s1263_s14 = scalar_lea.hbm %s1567_s26, 128  ;;  %s1267_s21 = scalar_lea.hbm %s1693_s7, 1024 }
 0x11f   : > { %p1264_p13 = scmp.ne.s32.totalorder %s1567_s26, %s1263_s14  ;;  %p1268_p2 = scmp.lt.u32.totalorder %s1567_s26, %s1693_s7 }
 0x120   : > { %p1269_p4 = scmp.lt.u32.totalorder %s1267_s21, %s1263_s14  ;;  %p1271_p6 = scmp.lt.u32.totalorder %s1263_s14, %s1567_s26 }
 0x121   : > { %p1265_p0 = pnand %p1264_p13, %p1486_p3 }
 0x122   : > { %p1270_p5 = por %p1269_p4, %p1268_p2 }
 0x123   : > { %p1266_p1 = pneg %p1265_p0 }
 0x124   : > { %p1272_p7 = por %p1271_p6, %p1270_p5 }
 0x126   : > { %p1273_p9 = pnand %p1272_p7, %p1266_p1 }
 0x128   : > { %1276 = shalt.err (!%p1273_p9)
}
 0x129   : > { %1137 = dma.vmem_to_hbm [thread:$0]  (%p1486_p3), %s1569_s3, 128, %s1567_s26, %s762_s1   ;;  %v1056_v24 = vld [vmem:[%s511_s18] ss:$0 sm:$0xff]  ;;  %v756_v25 = vpop.f32.mrb[2].mxu0 }
 0x12a   : > { %s474_s12 = scalar_lea.vmem [#allocation6], %s1540_s20  ;;  %v757_v26 = vadd.f32 %v1056_v24, %v756_v25  ;;  %v1118_v27 = vpop.f32.mrb[3].mxu0  ;;  %s1634_s21 = scalar_lea.hbm %s1695_s9, %s1551_s19 }
 0x12b   : > { %s820_s29 = sshll.u32 %s474_s12, 4  ;;  %s1382_s28 = smov [#allocation6]   ;;  %s821_s29 = int_to_ptr.vmem [resolvable:$true] %s820_s29 }
 0x12c   : > { %760 = vst.msk [vmem:[%s474_s12] sm:$0xff] %vm598_vm2, %v757_v26  ;;  %s1277_s0 = scalar_lea.vmem %s821_s29, 128  ;;  %s1281_s3 = sshll.u32 %s1382_s28, 4  ;;  %s1282_s3 = int_to_ptr.vmem [resolvable:$false] %s1281_s3 }
 0x12d   : > { %p1278_p10 = scmp.ne.s32.totalorder %s821_s29, %s1277_s0  ;;  %s1283_s20 = scalar_lea.vmem %s1282_s3, 256 }
 0x12e   : > { %p1284_p13 = scmp.lt.s32.totalorder %s821_s29, %s1282_s3  ;;  %p1285_p0 = scmp.lt.s32.totalorder %s1283_s20, %s1277_s0 }
 0x12f   : > { %p1279_p11 = pnand %p1278_p10, %p1486_p3 }
 0x130   : > { %p1286_p1 = por %p1285_p0, %p1284_p13 }
 0x131   : > { %p1280_p12 = pneg %p1279_p11 }
 0x133   : > { %p1287_p2 = pnand %p1286_p1, %p1280_p12 }
 0x135   : > { %1290 = shalt.err (!%p1287_p2)
}
 0x136   : > { %s1291_s19 = scalar_lea.hbm %s1634_s21, 128  ;;  %s1295_s1 = scalar_lea.hbm %s1695_s9, 1024 }
 0x137   : > { %p1292_p4 = scmp.ne.s32.totalorder %s1634_s21, %s1291_s19  ;;  %p1296_p7 = scmp.lt.u32.totalorder %s1634_s21, %s1695_s9 }
 0x138   : > { %p1297_p9 = scmp.lt.u32.totalorder %s1295_s1, %s1291_s19  ;;  %p1299_p11 = scmp.lt.u32.totalorder %s1291_s19, %s1634_s21 }
 0x139   : > { %p1293_p5 = pnand %p1292_p4, %p1486_p3 }
 0x13a   : > { %p1298_p10 = por %p1297_p9, %p1296_p7 }
 0x13b   : > { %p1294_p6 = pneg %p1293_p5 }
 0x13c   : > { %p1300_p12 = por %p1299_p11, %p1298_p10 }
 0x13e   : > { %p1301_p13 = pnand %p1300_p12, %p1294_p6 }
 0x140   : > { %1304 = shalt.err (!%p1301_p13)
}
 0x141   : > { %1139 = dma.vmem_to_hbm [thread:$0]  (%p1486_p3), %s821_s29, 128, %s1634_s21, %s767_s17  }
 0x142 PF: > { %p1153_p0 = scmp.ge.s32.totalorder %s1375_s16, 2  ;;  %s832_s24 = sand.u32 1, %s1347_s30  }
 0x143   : > { %s833_s12 = scalar_lea.sflag [#allocation3], %s832_s24 }
 0x144   : > { %p1144_p1 = pnand %p1153_p0, %p1497_p8 }
 0x146   : > { %1338 = dma.done.wait (!%p1144_p1), %s833_s12, 128  }
 0x147   : > { %1340 = vsyncadd (!%p1144_p1), %s833_s12, 4294967168  ;;  %s1718_s14 = sadd.s32 4294967294, %s1375_s16  }
 0x148   : > { %s841_s27 = sand.u32 1, %s1718_s14  }
 0x149   : > { %s842_s0 = scalar_lea.sflag [#allocation5], %s841_s27 }
 0x14a   : > { %1342 = dma.done.wait (!%p1144_p1), %s842_s0, 256  }
 0x14b   : > { %1344 = vsyncadd (!%p1144_p1), %s842_s0, 4294967040  ;;  %s26_s16 = sadd.s32 1, %s1375_s16   ;;  %s1719_s22 = sld [smem:[#allocation13_spill]] }
 0x14c   : > { %p23_p3 = scmp.ge.s32.totalorder %s26_s16, 10   ;;  %s1720_s12 = sld [smem:[#allocation9_spill]] }
 0x14d   : > { %s1721_s13 = sld [smem:[#allocation10_spill]]  ;;  %s1722_s14 = sld [smem:[#allocation11_spill]] }
 0x14e   : > { %s1723_s15 = sld [smem:[#allocation12_spill]]  ;;  %s1724_s30 = smov %s1351_s10 }
 0x14f   : > { %s1725_s10 = smov %s1355_s11  ;;  %25 = sbr.rel (!%p23_p3) target bundleno = 11 (0xb), region = 133 }
 0x151   : > { %s1726_s11 = smov %s1719_s22 }
 0x156   :  { %856 = vsyncpa [#allocation3], 1 }
 0x157   :  { %858 = vsyncpa [#allocation3 + $0x1], 1 }
 0x158   :  { %859 = vsyncpa [#allocation5], 1 }
 0x159   :  { %861 = vsyncpa [#allocation5 + $0x1], 1 }

</bundles_post_ra>
